<compile_context>
chip_gen: v7x
topology: tpu7x:2x2x1
jax: 0.10.0
libtpu: 0.0.40
codegen_flags: <defaults>
</compile_context>

<pallas_src>
import functools

import jax
import jax.numpy as jnp
from jax.experimental import pallas as pl
from jax.experimental.pallas import tpu as pltpu


def _sepconv_kernel(x_ref, w_ref, shift_ref, mask_ref, o_ref, *, K, W, pad, hw):
    # x_ref:     (1, C_tile, H*W)   flattened spatial slab (lane axis = H*W)
    # w_ref:     (C_tile, K*K)      depthwise weights with BN scale folded in
    # shift_ref: (C_tile, 1)        f32 BN shift = beta - mean * scale
    # mask_ref:  (K*K, H*W)         precomputed edge-validity masks (0/1)
    # o_ref:     (1, C_tile, H*W)
    x = x_ref[0]                       # (C_tile, HW), compute dtype
    w = w_ref[...]                     # (C_tile, K*K)
    m = mask_ref[...]                  # (K*K, HW)

    acc = None
    for kh in range(K):
        for kw in range(K):
            t = kh * K + kw
            delta = (kh - pad) * W + (kw - pad)   # source offset in flat index
            if delta == 0:
                src = x                           # center tap: always in-bounds
            else:
                src = pltpu.roll(x, (-delta) % hw, axis=1) * m[t]
            tap = (src * w[:, t][:, None]).astype(jnp.float32)
            acc = tap if acc is None else acc + tap

    y = acc + shift_ref[...]           # BN shift in f32 (scale folded into weights)
    y = jnp.maximum(y, 0.01 * y)       # LeakyReLU, default slope 0.01 (slope > 0)
    o_ref[0] = y.astype(o_ref.dtype)


def basic_sep_conv(x, weight, gamma, beta, run_mean, run_var,
                   *, padding=1, eps=1e-5):
    """x: (N, C, H, W); weight: (C, 1, K, K) depthwise (groups=C) filter."""
    N, C, H, W = x.shape
    K = weight.shape[-1]
    if 2 * padding != K - 1:
        raise NotImplementedError("kernel assumes 'same' padding (2*pad == K-1)")
    HW = H * W

    # ---- generation hints (safe fallbacks; plain host-side queries) ----------
    try:
        kind = jax.devices()[0].device_kind.lower()
    except Exception:
        kind = ""
    is_v5 = "v5" in kind
    is_v7 = "v7" in kind
    try:
        vmem_cap = int(pltpu.get_tpu_info().vmem_capacity_bytes)
    except Exception:
        vmem_cap = 64 << 20
    vmem_limit = min(int(vmem_cap * 0.6), 64 << 20)

    # Per-(input)block budget: 1 MiB on v5e (16 MiB scoped default, lowest BW),
    # 2 MiB on v7x (64 MiB physical / TC), 4 MiB otherwise (v6e, 128 MiB physical).
    if is_v5:
        block_budget = 1 << 20
    elif is_v7:
        block_budget = 2 << 20
    else:
        block_budget = 4 << 20

    # ---- compute dtype: keep bf16 activations bf16 through roll/mask/mul,
    #      accumulate taps + BN shift in f32 inside the kernel -----------------
    compute_dtype = jnp.bfloat16 if x.dtype == jnp.bfloat16 else jnp.float32

    # ---- fold eval-mode BN scale into the depthwise weights ------------------
    scale = (gamma.astype(jnp.float32) /
             jnp.sqrt(run_var.astype(jnp.float32) + eps))                  # (C,)
    shift = (beta.astype(jnp.float32)
             - run_mean.astype(jnp.float32) * scale).reshape(C, 1)         # f32
    w_folded = (weight.reshape(C, K * K).astype(jnp.float32)
                * scale[:, None]).astype(compute_dtype)

    # ---- precomputed edge-validity masks (one (K*K, HW) tensor, VMEM-resident,
    #      constant index_map) — removes per-tap iota/div/mod/compares ---------
    idx = jnp.arange(HW, dtype=jnp.int32)
    row = idx // W
    col = idx % W
    mask_rows = []
    for kh in range(K):
        for kw in range(K):
            dr, dc = kh - padding, kw - padding
            valid = ((row + dr >= 0) & (row + dr < H) &
                     (col + dc >= 0) & (col + dc < W))
            mask_rows.append(valid)
    masks = jnp.stack(mask_rows).astype(compute_dtype)                     # (K*K, HW)

    # Free reshape: flatten spatial dims onto the lane axis (no HBM pad pass).
    x_flat = x.reshape(N, C, HW)

    # ---- channel tile selection ----------------------------------------------
    bytes_per = jnp.dtype(x.dtype).itemsize

    def block_bytes(ct):
        return ct * HW * bytes_per

    if C % 8 == 0:
        c_tile = 8
        for cand in range(8, C + 1, 8):
            if C % cand == 0 and block_bytes(cand) <= block_budget:
                c_tile = cand
    else:
        c_tile = C                     # small / odd C: take the whole channel axis

    # v7x has 2 TensorCores: keep at least 2 parallel blocks when N == 1.
    if is_v7 and N == 1 and c_tile == C and C % 16 == 0:
        c_tile = C // 2

    # Rough per-step footprint: ~2 in + 2 out pipeline buffers + ~4 f32 slab
    # temporaries (acc / rolled tap) + the resident mask tensor. Fail loudly
    # instead of silently overflowing VMEM on huge feature maps.
    est = (4 * block_bytes(c_tile)
           + 4 * c_tile * HW * 4
           + K * K * HW * jnp.dtype(compute_dtype).itemsize)
    if est > vmem_limit:
        raise NotImplementedError(
            "feature map too large for a single (C_tile, H*W) slab; "
            "an H-split grid axis with halo is required")

    # ---- BlockSpecs (grid = (C/c_tile, N): weights/shift constant on inner axis)
    if is_v5:
        x_spec = pl.BlockSpec((1, c_tile, HW), lambda cb, n: (n, cb, 0),
                              pipeline_mode=pl.Buffered(3))
    else:
        x_spec = pl.BlockSpec((1, c_tile, HW), lambda cb, n: (n, cb, 0))

    kernel = functools.partial(_sepconv_kernel, K=K, W=W, pad=padding, hw=HW)
    out_flat = pl.pallas_call(
        kernel,
        out_shape=jax.ShapeDtypeStruct((N, C, HW), x.dtype),
        grid=(C // c_tile, N),
        in_specs=[
            x_spec,
            pl.BlockSpec((c_tile, K * K), lambda cb, n: (cb, 0)),
            pl.BlockSpec((c_tile, 1), lambda cb, n: (cb, 0)),
            pl.BlockSpec((K * K, HW), lambda cb, n: (0, 0)),
        ],
        out_specs=pl.BlockSpec((1, c_tile, HW), lambda cb, n: (n, cb, 0)),
        compiler_params=pltpu.CompilerParams(
            dimension_semantics=("parallel", "parallel"),
            vmem_limit_bytes=vmem_limit),
    )(x_flat, w_folded, shift, masks)
    return out_flat.reshape(N, C, H, W)


def _reference(x, weight, gamma, beta, run_mean, run_var, *, padding=1, eps=1e-5):
    C = x.shape[1]
    y = jax.lax.conv_general_dilated(
        x, weight, window_strides=(1, 1), padding=[(padding, padding)] * 2,
        dimension_numbers=("NCHW", "OIHW", "NCHW"), feature_group_count=C)
    scale = (gamma / jnp.sqrt(run_var + eps)).reshape(1, C, 1, 1)
    shift = (beta - run_mean * gamma / jnp.sqrt(run_var + eps)).reshape(1, C, 1, 1)
    y = y * scale + shift
    return jnp.where(y >= 0, y, 0.01 * y)


if __name__ == "__main__":
    key = jax.random.PRNGKey(0)
    k_x, k_w, k_g, k_b, k_m, k_v = jax.random.split(key, 6)

    N, C, H, W, K = 2, 4, 16, 16, 3    # BasicSepConv(in_planes=4, kernel_size=3, padding=1)
    x = jax.random.normal(k_x, (N, C, H, W), jnp.float32)
    weight = 0.1 * jax.random.normal(k_w, (C, 1, K, K), jnp.float32)  # groups=C depthwise
    gamma = 1.0 + 0.1 * jax.random.normal(k_g, (C,), jnp.float32)
    beta = 0.1 * jax.random.normal(k_b, (C,), jnp.float32)
    run_mean = 0.1 * jax.random.normal(k_m, (C,), jnp.float32)
    run_var = jax.random.uniform(k_v, (C,), jnp.float32, 0.5, 1.5)

    out = basic_sep_conv(x, weight, gamma, beta, run_mean, run_var, padding=1)
    out = jax.block_until_ready(out)

    ref = _reference(x, weight, gamma, beta, run_mean, run_var, padding=1)
    assert out.shape == (N, C, H, W)
    assert jnp.allclose(out, ref, atol=1e-4, rtol=1e-4), "mismatch vs reference"

    print("KERNEL_OK")
</pallas_src>

<mosaic_0001>
module attributes {stable_mosaic.version = 11 : i64} {
  func.func @_sepconv_kernel(%arg0: i32, %arg1: i32, %arg2: memref<1x4x256xf32, #tpu.memory_space<vmem>>, %arg3: memref<4x9xf32, #tpu.memory_space<vmem>>, %arg4: memref<4x1xf32, #tpu.memory_space<vmem>>, %arg5: memref<9x256xf32, #tpu.memory_space<vmem>>, %arg6: memref<1x4x256xf32, #tpu.memory_space<vmem>>) attributes {dimension_semantics = [#tpu.dimension_semantics<parallel>, #tpu.dimension_semantics<parallel>], iteration_bounds = array<i64: 1, 2>, scalar_prefetch = 0 : i64, scratch_operands = 0 : i64, tpu.core_type = #tpu.core_type<tc>, window_params = [{transform_indices = @transform_0, window_bounds = array<i64: 1, 4, 256>}, {transform_indices = @transform_1, window_bounds = array<i64: 4, 9>}, {transform_indices = @transform_2, window_bounds = array<i64: 4, 1>}, {pipeline_mode = #tpu.pipeline_mode<synchronous>, transform_indices = @transform_3, window_bounds = array<i64: 9, 256>}, {transform_indices = @transform_4, window_bounds = array<i64: 1, 4, 256>}]} {
    %c0 = arith.constant 0 : index
    %c0_0 = arith.constant 0 : index
    %c0_1 = arith.constant 0 : index
    %0 = vector.load %arg2[%c0, %c0_0, %c0_1] : memref<1x4x256xf32, #tpu.memory_space<vmem>>, vector<1x4x256xf32>
    %1 = vector.shape_cast %0 : vector<1x4x256xf32> to vector<4x256xf32>
    %c0_2 = arith.constant 0 : index
    %c0_3 = arith.constant 0 : index
    %2 = vector.load %arg3[%c0_2, %c0_3] : memref<4x9xf32, #tpu.memory_space<vmem>>, vector<4x9xf32>
    %c0_4 = arith.constant 0 : index
    %c0_5 = arith.constant 0 : index
    %3 = vector.load %arg5[%c0_4, %c0_5] : memref<9x256xf32, #tpu.memory_space<vmem>>, vector<9x256xf32>
    %c17_i32 = arith.constant 17 : i32
    %4 = tpu.dynamic_rotate %1 by %c17_i32 dim 1 : vector<4x256xf32>, i32 -> vector<4x256xf32>
    %5 = vector.extract_strided_slice %3 {offsets = [0, 0], sizes = [1, 256], strides = [1, 1]} : vector<9x256xf32> to vector<1x256xf32>
    %6 = vector.shape_cast %5 : vector<1x256xf32> to vector<256xf32>
    %7 = vector.shape_cast %6 : vector<256xf32> to vector<1x256xf32>
    %8 = vector.broadcast %7 : vector<1x256xf32> to vector<4x256xf32>
    %9 = arith.mulf %4, %8 : vector<4x256xf32>
    %10 = vector.extract_strided_slice %2 {offsets = [0, 0], sizes = [4, 1], strides = [1, 1]} : vector<4x9xf32> to vector<4x1xf32>
    %11 = vector.shape_cast %10 : vector<4x1xf32> to vector<4xf32>
    %12 = vector.shape_cast %11 : vector<4xf32> to vector<4x1xf32>
    %13 = vector.broadcast %12 : vector<4x1xf32> to vector<4x256xf32>
    %14 = arith.mulf %9, %13 : vector<4x256xf32>
    %c16_i32 = arith.constant 16 : i32
    %15 = tpu.dynamic_rotate %1 by %c16_i32 dim 1 : vector<4x256xf32>, i32 -> vector<4x256xf32>
    %16 = vector.extract_strided_slice %3 {offsets = [1, 0], sizes = [1, 256], strides = [1, 1]} : vector<9x256xf32> to vector<1x256xf32>
    %17 = vector.shape_cast %16 : vector<1x256xf32> to vector<256xf32>
    %18 = vector.shape_cast %17 : vector<256xf32> to vector<1x256xf32>
    %19 = vector.broadcast %18 : vector<1x256xf32> to vector<4x256xf32>
    %20 = arith.mulf %15, %19 : vector<4x256xf32>
    %21 = vector.extract_strided_slice %2 {offsets = [0, 1], sizes = [4, 1], strides = [1, 1]} : vector<4x9xf32> to vector<4x1xf32>
    %22 = vector.shape_cast %21 : vector<4x1xf32> to vector<4xf32>
    %23 = vector.shape_cast %22 : vector<4xf32> to vector<4x1xf32>
    %24 = vector.broadcast %23 : vector<4x1xf32> to vector<4x256xf32>
    %25 = arith.mulf %20, %24 : vector<4x256xf32>
    %26 = arith.addf %14, %25 : vector<4x256xf32>
    %c15_i32 = arith.constant 15 : i32
    %27 = tpu.dynamic_rotate %1 by %c15_i32 dim 1 : vector<4x256xf32>, i32 -> vector<4x256xf32>
    %28 = vector.extract_strided_slice %3 {offsets = [2, 0], sizes = [1, 256], strides = [1, 1]} : vector<9x256xf32> to vector<1x256xf32>
    %29 = vector.shape_cast %28 : vector<1x256xf32> to vector<256xf32>
    %30 = vector.shape_cast %29 : vector<256xf32> to vector<1x256xf32>
    %31 = vector.broadcast %30 : vector<1x256xf32> to vector<4x256xf32>
    %32 = arith.mulf %27, %31 : vector<4x256xf32>
    %33 = vector.extract_strided_slice %2 {offsets = [0, 2], sizes = [4, 1], strides = [1, 1]} : vector<4x9xf32> to vector<4x1xf32>
    %34 = vector.shape_cast %33 : vector<4x1xf32> to vector<4xf32>
    %35 = vector.shape_cast %34 : vector<4xf32> to vector<4x1xf32>
    %36 = vector.broadcast %35 : vector<4x1xf32> to vector<4x256xf32>
    %37 = arith.mulf %32, %36 : vector<4x256xf32>
    %38 = arith.addf %26, %37 : vector<4x256xf32>
    %c1_i32 = arith.constant 1 : i32
    %39 = tpu.dynamic_rotate %1 by %c1_i32 dim 1 : vector<4x256xf32>, i32 -> vector<4x256xf32>
    %40 = vector.extract_strided_slice %3 {offsets = [3, 0], sizes = [1, 256], strides = [1, 1]} : vector<9x256xf32> to vector<1x256xf32>
    %41 = vector.shape_cast %40 : vector<1x256xf32> to vector<256xf32>
    %42 = vector.shape_cast %41 : vector<256xf32> to vector<1x256xf32>
    %43 = vector.broadcast %42 : vector<1x256xf32> to vector<4x256xf32>
    %44 = arith.mulf %39, %43 : vector<4x256xf32>
    %45 = vector.extract_strided_slice %2 {offsets = [0, 3], sizes = [4, 1], strides = [1, 1]} : vector<4x9xf32> to vector<4x1xf32>
    %46 = vector.shape_cast %45 : vector<4x1xf32> to vector<4xf32>
    %47 = vector.shape_cast %46 : vector<4xf32> to vector<4x1xf32>
    %48 = vector.broadcast %47 : vector<4x1xf32> to vector<4x256xf32>
    %49 = arith.mulf %44, %48 : vector<4x256xf32>
    %50 = arith.addf %38, %49 : vector<4x256xf32>
    %51 = vector.extract_strided_slice %2 {offsets = [0, 4], sizes = [4, 1], strides = [1, 1]} : vector<4x9xf32> to vector<4x1xf32>
    %52 = vector.shape_cast %51 : vector<4x1xf32> to vector<4xf32>
    %53 = vector.shape_cast %52 : vector<4xf32> to vector<4x1xf32>
    %54 = vector.broadcast %53 : vector<4x1xf32> to vector<4x256xf32>
    %55 = arith.mulf %1, %54 : vector<4x256xf32>
    %56 = arith.addf %50, %55 : vector<4x256xf32>
    %c255_i32 = arith.constant 255 : i32
    %57 = tpu.dynamic_rotate %1 by %c255_i32 dim 1 : vector<4x256xf32>, i32 -> vector<4x256xf32>
    %58 = vector.extract_strided_slice %3 {offsets = [5, 0], sizes = [1, 256], strides = [1, 1]} : vector<9x256xf32> to vector<1x256xf32>
    %59 = vector.shape_cast %58 : vector<1x256xf32> to vector<256xf32>
    %60 = vector.shape_cast %59 : vector<256xf32> to vector<1x256xf32>
    %61 = vector.broadcast %60 : vector<1x256xf32> to vector<4x256xf32>
    %62 = arith.mulf %57, %61 : vector<4x256xf32>
    %63 = vector.extract_strided_slice %2 {offsets = [0, 5], sizes = [4, 1], strides = [1, 1]} : vector<4x9xf32> to vector<4x1xf32>
    %64 = vector.shape_cast %63 : vector<4x1xf32> to vector<4xf32>
    %65 = vector.shape_cast %64 : vector<4xf32> to vector<4x1xf32>
    %66 = vector.broadcast %65 : vector<4x1xf32> to vector<4x256xf32>
    %67 = arith.mulf %62, %66 : vector<4x256xf32>
    %68 = arith.addf %56, %67 : vector<4x256xf32>
    %c241_i32 = arith.constant 241 : i32
    %69 = tpu.dynamic_rotate %1 by %c241_i32 dim 1 : vector<4x256xf32>, i32 -> vector<4x256xf32>
    %70 = vector.extract_strided_slice %3 {offsets = [6, 0], sizes = [1, 256], strides = [1, 1]} : vector<9x256xf32> to vector<1x256xf32>
    %71 = vector.shape_cast %70 : vector<1x256xf32> to vector<256xf32>
    %72 = vector.shape_cast %71 : vector<256xf32> to vector<1x256xf32>
    %73 = vector.broadcast %72 : vector<1x256xf32> to vector<4x256xf32>
    %74 = arith.mulf %69, %73 : vector<4x256xf32>
    %75 = vector.extract_strided_slice %2 {offsets = [0, 6], sizes = [4, 1], strides = [1, 1]} : vector<4x9xf32> to vector<4x1xf32>
    %76 = vector.shape_cast %75 : vector<4x1xf32> to vector<4xf32>
    %77 = vector.shape_cast %76 : vector<4xf32> to vector<4x1xf32>
    %78 = vector.broadcast %77 : vector<4x1xf32> to vector<4x256xf32>
    %79 = arith.mulf %74, %78 : vector<4x256xf32>
    %80 = arith.addf %68, %79 : vector<4x256xf32>
    %c240_i32 = arith.constant 240 : i32
    %81 = tpu.dynamic_rotate %1 by %c240_i32 dim 1 : vector<4x256xf32>, i32 -> vector<4x256xf32>
    %82 = vector.extract_strided_slice %3 {offsets = [7, 0], sizes = [1, 256], strides = [1, 1]} : vector<9x256xf32> to vector<1x256xf32>
    %83 = vector.shape_cast %82 : vector<1x256xf32> to vector<256xf32>
    %84 = vector.shape_cast %83 : vector<256xf32> to vector<1x256xf32>
    %85 = vector.broadcast %84 : vector<1x256xf32> to vector<4x256xf32>
    %86 = arith.mulf %81, %85 : vector<4x256xf32>
    %87 = vector.extract_strided_slice %2 {offsets = [0, 7], sizes = [4, 1], strides = [1, 1]} : vector<4x9xf32> to vector<4x1xf32>
    %88 = vector.shape_cast %87 : vector<4x1xf32> to vector<4xf32>
    %89 = vector.shape_cast %88 : vector<4xf32> to vector<4x1xf32>
    %90 = vector.broadcast %89 : vector<4x1xf32> to vector<4x256xf32>
    %91 = arith.mulf %86, %90 : vector<4x256xf32>
    %92 = arith.addf %80, %91 : vector<4x256xf32>
    %c239_i32 = arith.constant 239 : i32
    %93 = tpu.dynamic_rotate %1 by %c239_i32 dim 1 : vector<4x256xf32>, i32 -> vector<4x256xf32>
    %94 = vector.extract_strided_slice %3 {offsets = [8, 0], sizes = [1, 256], strides = [1, 1]} : vector<9x256xf32> to vector<1x256xf32>
    %95 = vector.shape_cast %94 : vector<1x256xf32> to vector<256xf32>
    %96 = vector.shape_cast %95 : vector<256xf32> to vector<1x256xf32>
    %97 = vector.broadcast %96 : vector<1x256xf32> to vector<4x256xf32>
    %98 = arith.mulf %93, %97 : vector<4x256xf32>
    %99 = vector.extract_strided_slice %2 {offsets = [0, 8], sizes = [4, 1], strides = [1, 1]} : vector<4x9xf32> to vector<4x1xf32>
    %100 = vector.shape_cast %99 : vector<4x1xf32> to vector<4xf32>
    %101 = vector.shape_cast %100 : vector<4xf32> to vector<4x1xf32>
    %102 = vector.broadcast %101 : vector<4x1xf32> to vector<4x256xf32>
    %103 = arith.mulf %98, %102 : vector<4x256xf32>
    %104 = arith.addf %92, %103 : vector<4x256xf32>
    %c0_6 = arith.constant 0 : index
    %c0_7 = arith.constant 0 : index
    %105 = vector.load %arg4[%c0_6, %c0_7] : memref<4x1xf32, #tpu.memory_space<vmem>>, vector<4x1xf32>
    %106 = vector.broadcast %105 : vector<4x1xf32> to vector<4x256xf32>
    %107 = arith.addf %104, %106 : vector<4x256xf32>
    %cst = arith.constant 0.00999999977 : f32
    %108 = vector.broadcast %cst : f32 to vector<4x256xf32>
    %109 = arith.mulf %108, %107 : vector<4x256xf32>
    %110 = arith.maximumf %107, %109 : vector<4x256xf32>
    %c0_8 = arith.constant 0 : index
    %c0_9 = arith.constant 0 : index
    %c0_10 = arith.constant 0 : index
    %111 = vector.load %arg6[%c0_8, %c0_9, %c0_10] : memref<1x4x256xf32, #tpu.memory_space<vmem>>, vector<1x4x256xf32>
    %112 = vector.shape_cast %111 : vector<1x4x256xf32> to vector<4x256xf32>
    %113 = vector.shape_cast %110 : vector<4x256xf32> to vector<1x4x256xf32>
    tpu.vector_store %arg6[%c0_8, %c0_9, %c0_10], %113 {strides = array<i32>} : memref<1x4x256xf32, #tpu.memory_space<vmem>>, vector<1x4x256xf32>,
    return
  }
  func.func @transform_0(%arg0: i32, %arg1: i32) -> (i32, i32, i32) {
    %c0_i32 = arith.constant 0 : i32
    %c0_i32_0 = arith.constant 0 : i32
    return %arg1, %arg0, %c0_i32 : i32, i32, i32
  }
  func.func @transform_1(%arg0: i32, %arg1: i32) -> (i32, i32) {
    %c0_i32 = arith.constant 0 : i32
    %c0_i32_0 = arith.constant 0 : i32
    return %arg0, %c0_i32 : i32, i32
  }
  func.func @transform_2(%arg0: i32, %arg1: i32) -> (i32, i32) {
    %c0_i32 = arith.constant 0 : i32
    %c0_i32_0 = arith.constant 0 : i32
    return %arg0, %c0_i32 : i32, i32
  }
  func.func @transform_3(%arg0: i32, %arg1: i32) -> (i32, i32) {
    %c0_i32 = arith.constant 0 : i32
    %c0_i32_0 = arith.constant 0 : i32
    %c0_i32_1 = arith.constant 0 : i32
    return %c0_i32, %c0_i32_0 : i32, i32
  }
  func.func @transform_4(%arg0: i32, %arg1: i32) -> (i32, i32, i32) {
    %c0_i32 = arith.constant 0 : i32
    %c0_i32_0 = arith.constant 0 : i32
    return %arg1, %arg0, %c0_i32 : i32, i32, i32
  }
}

</mosaic_0001>

<bundles_post_ra>
// kernel: tpu_custom_call.1
= control target key start
LH: loop header
LB: loop body
LE: loop exit
PB: predicated region body
PF: predicated region fallthrough
CT: control target
= control target key end

     0   :  { %9 = vsyncpa [#allocation3], 0  ;;  %s1293_s0 = inlined_call_operand.hbm [shape: f32[2,4,256], index: 0, kind: input, shape index: {}]   ;;  %s1294_s1 = inlined_call_operand.vmem [shape: f32[4,9], index: 1, kind: input, shape index: {}]   ;;  %s1295_s2 = inlined_call_operand.vmem [shape: f32[4,1], index: 2, kind: input, shape index: {}]   ;;  %s1296_s3 = inlined_call_operand.hbm [shape: f32[9,256], index: 3, kind: input, shape index: {}]   ;;  %s1297_s4 = inlined_call_operand.hbm [shape: f32[2,4,256], index: 4, kind: output, shape index: {}]  }
   0x1   :  { %11 = vsyncpa [#allocation3 + $0x1], 0 }
   0x2   :  { %12 = vsyncpa [#allocation6], 0 }
   0x3   :  { %13 = vsyncpa [#allocation4], 0 }
   0x4   :  { %15 = vsyncpa [#allocation4 + $0x1], 0  ;;  %s987_s15 = smov 0   ;;  %s989_s16 = smov 0  }
   0x5   :  { %s991_s17 = smov 0   ;;  %s993_s18 = smov 0  }
   0x6   :  { %s995_s19 = smov 0   ;;  %s997_s20 = smov 0  }
   0x7 LB: > { %s666_s21 = sadd.s32 4294967295, %s937_s20   ;;  %s667_s22 = sadd.s32 4294967294, %s937_s20   ;;  %s937_s20 = sphi %s997_s20, %s21_s20   ;;  %s933_s19 = sphi %s995_s19, %s1321_s19   ;;  %s929_s18 = sphi %s993_s18, %s1320_s18   ;;  %s925_s17 = sphi %s991_s17, %s1319_s17   ;;  %s921_s16 = sphi %s989_s16, %s1318_s16   ;;  %s917_s15 = sphi %s987_s15, %s1317_s15  }
   0x8   : > { %p55_p0 = scmp.ne.s32.totalorder %s921_s16, %s917_s15  ;;  %p1021_p1 = scmp.eq.s32.totalorder %s666_s21, 0 }
   0x9   : > { %p1025_p2 = scmp.eq.s32.totalorder %s666_s21, 1  ;;  %p160_p3 = scmp.eq.s32.totalorder %s667_s22, 1 }
   0xa   : > { %s1302_s23 = scalar_select %p1021_p1, 1, 0 }
   0xb   : > { %s1303_s24 = scalar_select %p1025_p2, 1, 0 }
   0xc   : > { %p1031_p4 = por %p1021_p1, %p55_p0  ;;  %p668_p5 = scmp.ge.s32.totalorder %s937_s20, 1 }
   0xd   : > { %p1036_p6 = por %p160_p3, %p55_p0  ;;  %p167_p7 = scmp.lt.s32.totalorder %s937_s20, 3 }
   0xe   : > { %s1304_s25 = scalar_select %p1031_p4, 1, 0 }
   0xf   : > { %s1305_s26 = scalar_select %p1036_p6, 1, 0 }
  0x10   : > { %p1041_p8 = pnand %p668_p5, %p167_p7  ;;  %s939_s28 = smov [#allocation5]  }
  0x11   : > { %s193_s29 = sshll.u32 %s939_s28, 4  ;;  %s30_s5 = sadd.s32 1, %s933_s19  ;;  %s194_s29 = int_to_ptr.vmem [resolvable:$true] %s193_s29 }
  0x12   : > { %s1306_s27 = scalar_select %p1041_p8, 1, 0 }
  0x13   : > { %p697_p9 = pneg %p1041_p8  ;;  %s793_s8 = scalar_lea.hbm %s1296_s3, 512 }
  0x14   : > { %p794_p12 = scmp.ne.s32.totalorder %s1296_s3, %s793_s8  ;;  %p800_p5 = scmp.lt.u32.totalorder %s793_s8, %s1296_s3 }
  0x15   : > { %p1050_p11 = pnand %p697_p9, %p1021_p1 }
  0x17   : > { %p795_p13 = pneg %p1050_p11 }
  0x19   : > { %p796_p0 = pnand %p795_p13, %p794_p12 }
  0x1b   : > { %p797_p3 = pneg %p796_p0 }
  0x1d   : > { %p802_p7 = pnand %p800_p5, %p797_p3 }
  0x1f   : > { %805 = shalt.err (!%p802_p7)
}
  0x20   : > { %s806_s13 = scalar_lea.vmem %s194_s29, 512  ;;  %p814_p1 = scmp.lt.s32.totalorder %s194_s29, %s194_s29 }
  0x21   : > { %p807_p9 = scmp.ne.s32.totalorder %s194_s29, %s806_s13  ;;  %p815_p4 = scmp.lt.s32.totalorder %s806_s13, %s806_s13 }
  0x23   : > { %p809_p10 = pnand %p807_p9, %p795_p13  ;;  %p816_p8 = por %p815_p4, %p814_p1 }
  0x25   : > { %p810_p6 = pneg %p809_p10 }
  0x27   : > { %p817_p2 = pnand %p816_p8, %p810_p6 }
  0x29   : > { %820 = shalt.err (!%p817_p2)
}
  0x2a   : > { %s940_s14 = smov 256   ;;  %s941_s21 = smov 16  }
  0x2b   : > { %700 = dma.hbm_to_vmem [thread:$0]  (!%p1050_p11), %s1296_s3, 512, %s194_s29, [#allocation6], %s940_s14, %s940_s14, %s941_s21  }
  0x2c   : > { %p31_p1 = scmp.ge.s32.totalorder %s30_s5, 2  ;;  %s42_s6 = sadd.s32 1, %s925_s17 }
  0x2d   : > { %p49_p2 = scmp.ne.s32.totalorder %s925_s17, %s921_s16  ;;  %p50_p4 = scmp.eq.s32.totalorder %s937_s20, 0 }
  0x2e   : > { %s1323_s5 = smov (%p31_p1, %s30_s5), 0  ;;  %p1309_p8 = scmp.ne.s32.totalorder %s1303_s24, 0 }
  0x2f   : > { %p1077_p6 = por %p50_p4, %p49_p2  ;;  %s37_s30 = ssub.s32 %s933_s19, %s1323_s5 }
  0x30   : > { %p1083_p10 = por %p1309_p8, %p49_p2  ;;  %p710_p12 = scmp.lt.s32.totalorder %s937_s20, 2 }
  0x31   : > { %p40_p11 = scmp.eq.s32.totalorder %s37_s30, 0  ;;  %s207_s29 = sand.u32 1, %s925_s17  }
  0x32   : > { %s673_s9 = sshll.u32 %s207_s29, 3  ;;  %s687_s11 = sshll.u32 %s933_s19, 7 }
  0x33   : > { %s1092_s10 = scalar_select %p40_p11, %s925_s17, %s42_s6  }
  0x34   : > { %s1098_s14 = scalar_lea.hbm %s1293_s0, %s687_s11  ;;  %s211_s24 = scalar_lea.vmem [#allocation2], %s673_s9 }
  0x35   : > { %s221_s21 = sshll.u32 %s211_s24, 4  ;;  %p1104_p13 = pnand %p710_p12, %p1077_p6  ;;  %s1100_s21 = int_to_ptr.vmem [resolvable:$true] %s221_s21 }
  0x36   : > { %s208_s28 = scalar_lea.sflag [#allocation3], %s207_s29  ;;  %s821_s6 = scalar_lea.hbm %s1098_s14, 128 }
  0x37   : > { %p822_p0 = scmp.ne.s32.totalorder %s1098_s14, %s821_s6  ;;  %p823_p3 = pneg %p1104_p13 }
  0x38   : > { %s826_s11 = scalar_lea.hbm %s1293_s0, 256  ;;  %p827_p9 = scmp.lt.u32.totalorder %s1098_s14, %s1293_s0 }
  0x39   : > { %p824_p5 = pnand %p823_p3, %p822_p0  ;;  %p828_p1 = scmp.lt.u32.totalorder %s826_s11, %s821_s6 }
  0x3a   : > { %p830_p4 = scmp.lt.u32.totalorder %s821_s6, %s1098_s14 }
  0x3b   : > { %p825_p7 = pneg %p824_p5  ;;  %p829_p2 = por %p828_p1, %p827_p9 }
  0x3d   : > { %p831_p6 = por %p830_p4, %p829_p2 }
  0x3f   : > { %p832_p8 = pnand %p831_p6, %p825_p7 }
  0x41   : > { %835 = shalt.err (!%p832_p8)
}
  0x42   : > { %s836_s29 = scalar_lea.vmem %s1100_s21, 128  ;;  %s942_s13 = smov [#allocation2]  }
  0x43   : > { %p837_p12 = scmp.ne.s32.totalorder %s1100_s21, %s836_s29  ;;  %s841_s24 = sshll.u32 %s942_s13, 4  ;;  %s842_s24 = int_to_ptr.vmem [resolvable:$false] %s841_s24 }
  0x44   : > { %s843_s30 = scalar_lea.vmem %s842_s24, 256  ;;  %p844_p5 = scmp.lt.s32.totalorder %s1100_s21, %s842_s24 }
  0x45   : > { %p839_p11 = pnand %p837_p12, %p823_p3  ;;  %p845_p9 = scmp.lt.s32.totalorder %s843_s30, %s836_s29 }
  0x47   : > { %p840_p0 = pneg %p839_p11  ;;  %p846_p1 = por %p845_p9, %p844_p5 }
  0x49   : > { %p847_p2 = pnand %p846_p1, %p840_p0 }
  0x4b   : > { %850 = shalt.err (!%p847_p2)
}
  0x4c   : > { %704 = dma.hbm_to_vmem [thread:$0]  (!%p1104_p13), %s1098_s14, 128, %s1100_s21, %s208_s28  }
  0x4d   : > { %p1312_p7 = scmp.ne.s32.totalorder %s1306_s27, 0 }
  0x4e   : > { %s1136_s6 = sand.u32 (!%p1312_p7), 1, %s921_s16   ;;  %p1313_p3 = scmp.ne.s32.totalorder (!%p1312_p7), %s1304_s25, 0 }
  0x4f   : > { %230 = sbr.rel (%p1312_p7) target bundleno = 302 (0x12e), region = 36  ;;  %s677_s9 = sshll.u32 (!%p1312_p7), %s1136_s6, 3 }
  0x50   : > { %s233_s11 = scalar_lea.sflag (!%p1312_p7), [#allocation3], %s1136_s6  ;;  %s236_s7 = scalar_lea.vmem (!%p1312_p7), [#allocation2], %s677_s9 }
  0x56   : > { %904 = dma.done.wait (%p1313_p3), %s233_s11, 128  }
  0x57   : > { %906 = vsyncadd (%p1313_p3), %s233_s11, 4294967168  ;;  %p1314_p13 = scmp.ne.s32.totalorder %s1302_s23, 0 }
  0x59   : > { %908 = dma.done.wait (%p1314_p13), [#allocation6], 512  }
  0x5a   : > { %910 = vsyncadd (%p1314_p13), [#allocation6], 4294966784  ;;  %v943_v0 = vmov 2   ;;  %v944_v1 = vmov 0   ;;  %v282_v2 = vld [vmem:[%s1294_s1] sm:$0xf]  ;;  %v294_v22 = vlaneseq }
  0x5b   : > { %784 = vset.pattern.permute.xlu1 %v943_v0  ;;  %782 = vset.pattern.permute.xlu0 %v944_v1  ;;  %v1153_v3 = vld [vmem:[%s236_s7] sm:$0xff]  ;;  %v945_v4 = vmov 4   ;;  %v946_v5 = vmov 1   ;;  %s947_s23 = smov 17   ;;  %v948_v7 = vmov 3   ;;  %v949_v8 = vmov 5  }
  0x5c   : > { %359 = vperm.xlu1 %784, %v282_v2   ;;  %311 = vperm.xlu0 %782, %v282_v2   ;;  %v288_v6 = vcombine.high %v1153_v3, %v1153_v3  ;;  %s950_s25 = smov 16   ;;  %s951_s21 = smov 15   ;;  %v953_v9 = vmov 6   ;;  %v955_v10 = vmov 8   ;;  %v957_v11 = vmov 7   ;;  %v1184_v34 = vld [vmem:[#allocation5] sm:$0xff] }
  0x5d   : > { %s952_s22 = smov 1   ;;  %s954_s28 = smov 127   ;;  %v508_v12 = vld [vmem:[%s1295_s2] sm:$0xf]  ;;  %v1176_v25 = vshrl.u32 %v294_v22, 7  ;;  %v1178_v28 = vand.u32 127, %v294_v22 }
  0x5e   : > { %s956_s12 = smov 113   ;;  %s958_s29 = smov 111   ;;  %v960_v26 = vmov 839922192   ;;  %v1186_v35 = vld [vmem:[#allocation5 + $0x8] sm:$0xff] }
  0x5f   : > { %s959_s30 = smov 112   ;;  %v395_v27 = vunpack.c.l.s4 %v960_v26  ;;  %v325_v29 = vsub.s32 1, %v1176_v25  ;;  %v301_v32 = vsub.s32 0, %v1176_v25  ;;  %vm320_vm0 = vcmp.lt.s32.totalorder %v1178_v28, 16  ;;  %s688_s11 = sshll.u32 %s929_s18, 7 }
  0x60   : > { %785 = vset.pattern.permute.xlu1 %v945_v4  ;;  %783 = vset.pattern.permute.xlu0 %v946_v5  ;;  %v350_v33 = vsub.s32 2, %v1176_v25  ;;  %vm296_vm1 = vcmp.lt.s32.totalorder %v1178_v28, 17  ;;  %vm345_vm2 = vcmp.lt.s32.totalorder %v1178_v28, 15  ;;  %v375_v42 = vsub.s32 3, %v1176_v25  ;;  %s272_s7 = scalar_lea.vmem [#allocation7], %s677_s9  ;;  %s961_s18 = smov [#allocation7]  }
  0x61   : > { %392 = vperm.xlu1 %785, %v282_v2   ;;  %334 = vperm.xlu0 %783, %v282_v2   ;;  %v396_v36 = vunpack.c.0.s8 %v395_v27  ;;  %v326_v37 = vrot.slane %v1184_v34, %v325_v29  ;;  %v330_v38 = vrot.slane %v1186_v35, %v325_v29  ;;  %v302_v43 = vrot.slane %v1184_v34, %v301_v32  ;;  %s542_s27 = sshll.u32 %s272_s7, 4  ;;  %s855_s9 = sshll.u32 %s961_s18, 4  ;;  %s1246_s27 = int_to_ptr.vmem [resolvable:$true] %s542_s27  ;;  %s856_s9 = int_to_ptr.vmem [resolvable:$false] %s855_s9 }
  0x62   : > { %v306_v44 = vrot.slane %v1186_v35, %v301_v32  ;;  %v351_v45 = vrot.slane %v1184_v34, %v350_v33  ;;  %v355_v49 = vrot.slane %v1186_v35, %v350_v33  ;;  %vm370_vm3 = vcmp.lt.s32.totalorder %v1178_v28, 1  ;;  %p858_p12 = scmp.lt.s32.totalorder %s1246_s27, %s856_s9 }
  0x63   : > { %v399_v55 = vsub.s32 %v396_v36, %v1176_v25  ;;  %v376_v56 = vrot.slane %v1184_v34, %v375_v42  ;;  %v380_v57 = vrot.slane %v1186_v35, %v375_v42  ;;  %v417_v0 = vsub.s32 5, %v1176_v25 }
  0x64   : > { %vm412_vm4 = vcmp.lt.s32.totalorder %v1178_v28, 127  ;;  %vm437_vm5 = vcmp.lt.s32.totalorder %v1178_v28, 113  ;;  %vm462_vm6 = vcmp.lt.s32.totalorder %v1178_v28, 112  ;;  %vm487_vm7 = vcmp.lt.s32.totalorder %v1178_v28, 111 }
  0x65   : > { %290 = vrot.lane.b32.xlu1 %v1153_v3, %s947_s23  ;;  %292 = vrot.lane.b32.xlu0 %v288_v6, %s947_s23 }
  0x66   : > { %786 = vset.pattern.permute.xlu1 %v948_v7  ;;  %787 = vset.pattern.permute.xlu0 %v949_v8 }
  0x69   : > { %316 = vrot.lane.b32.xlu1 %v1153_v3, %s950_s25  ;;  %318 = vrot.lane.b32.xlu0 %v288_v6, %s950_s25  ;;  %s1244_s25 = scalar_lea.hbm %s1297_s4, %s688_s11 }
  0x6d   : > { %384 = vperm.xlu1 %786, %v282_v2   ;;  %341 = vrot.lane.b32.xlu0 %v1153_v3, %s951_s21 }
  0x71   : > { %343 = vrot.lane.b32.xlu1 %v288_v6, %s951_s21  ;;  %366 = vrot.lane.b32.xlu0 %v1153_v3, %s952_s22  ;;  %s526_s21 = scalar_lea.sflag [#allocation4], %s1136_s6 }
  0x72   : > { %788 = vset.pattern.permute.xlu1 %v953_v9 }
  0x75   : > { %368 = vrot.lane.b32.xlu1 %v288_v6, %s952_s22  ;;  %426 = vperm.xlu0 %787, %v282_v2   ;;  %s851_s22 = scalar_lea.vmem %s1246_s27, 128 }
  0x76   : > { %p852_p4 = scmp.ne.s32.totalorder %s1246_s27, %s851_s22 }
  0x78   : > { %p853_p6 = pnand %p852_p4, %p1083_p10 }
  0x79   : > { %451 = vperm.xlu1 %788, %v282_v2   ;;  %410 = vrot.lane.b32.xlu0 %v288_v6, %s954_s28 }
  0x7a   : > { %790 = vset.pattern.permute.xlu0 %v955_v10  ;;  %p854_p8 = pneg %p853_p6 }
  0x7d   : > { %408 = vrot.lane.b32.xlu1 %v1153_v3, %s954_s28  ;;  %433 = vrot.lane.b32.xlu0 %v1153_v3, %s956_s12  ;;  %s857_s28 = scalar_lea.vmem %s856_s9, 256 }
  0x7e   : > { %789 = vset.pattern.permute.xlu1 %v957_v11  ;;  %v442_v11 = vsub.s32 6, %v1176_v25  ;;  %p859_p11 = scmp.lt.s32.totalorder %s857_s28, %s851_s22 }
  0x80   : > { %v443_v27 = vrot.slane %v1184_v34, %v442_v11  ;;  %v447_v29 = vrot.slane %v1186_v35, %v442_v11  ;;  %p860_p0 = por %p859_p11, %p858_p12 }
  0x81   : > { %476 = vperm.xlu1 %789, %v282_v2   ;;  %501 = vperm.xlu0 %790, %v282_v2  }
  0x82   : > { %p861_p5 = pnand %p860_p0, %p854_p8 }
  0x85   : > { %435 = vrot.lane.b32.xlu1 %v288_v6, %s956_s12  ;;  %483 = vrot.lane.b32.xlu0 %v1153_v3, %s958_s29 }
  0x86   : > { %791 = vset.pattern.permute.xlu0 %v944_v1 }
  0x89   : > { %458 = vrot.lane.b32.xlu1 %v1153_v3, %s959_s30  ;;  %511 = vperm.xlu0 %791, %v508_v12  }
  0x8d   : > { %460 = vrot.lane.b32.xlu1 %v288_v6, %s959_s30 }
  0x91   : > { %485 = vrot.lane.b32.xlu1 %v288_v6, %s958_s29 }
  0xdb   : > { %v1168_v13 = vpop.permute.xlu1 %359  ;;  %v1170_v14 = vpop.permute.xlu0 %311 }
  0xe0   : > { %v1172_v15 = vpop.permute.xlu1 %392  ;;  %v335_v16 = vpop.permute.xlu0 %334 }
  0xe1   : > { %v400_v8 = vrot.slane %v1172_v15, %v399_v55 }
  0xe4   : > { %v291_v17 = vpop.permute.xlu1 %290  ;;  %v293_v18 = vpop.permute.xlu0 %292 }
  0xe5   : > { %v297_v47 = vsel %vm296_vm1, %v291_v17, %v293_v18  ;;  %v298_v48 = vsel %vm296_vm1, %v293_v18, %v291_v17 }
  0xe6   : > { %v307_v58 = vmul.f32 %v302_v43, %v298_v48  ;;  %v308_v59 = vmul.f32 %v306_v44, %v297_v47 }
  0xe8   : > { %v317_v19 = vpop.permute.xlu1 %316  ;;  %v319_v20 = vpop.permute.xlu0 %318  ;;  %v314_v9 = vmul.f32 %v1170_v14, %v307_v58  ;;  %v315_v10 = vmul.f32 %v1170_v14, %v308_v59 }
  0xe9   : > { %v321_v40 = vsel %vm320_vm0, %v317_v19, %v319_v20  ;;  %v322_v41 = vsel %vm320_vm0, %v319_v20, %v317_v19  ;;  %v422_v20 = vrot.slane %v1186_v35, %v417_v0 }
  0xea   : > { %v331_v50 = vmul.f32 %v326_v37, %v322_v41  ;;  %v332_v51 = vmul.f32 %v330_v38, %v321_v40 }
  0xec   : > { %v1174_v21 = vpop.permute.xlu1 %384  ;;  %v342_v23 = vpop.permute.xlu0 %341  ;;  %v337_v1 = vmul.f32 %v335_v16, %v331_v50  ;;  %v338_v2 = vmul.f32 %v335_v16, %v332_v51  ;;  %v418_v16 = vrot.slane %v1184_v34, %v417_v0 }
  0xee   : > { %v339_v18 = vadd.f32 %v337_v1, %v314_v9  ;;  %v340_v19 = vadd.f32 %v338_v2, %v315_v10 }
  0xf0   : > { %v344_v24 = vpop.permute.xlu1 %343  ;;  %v367_v30 = vpop.permute.xlu0 %366 }
  0xf1   : > { %v346_v52 = vsel %vm345_vm2, %v342_v23, %v344_v24  ;;  %v347_v53 = vsel %vm345_vm2, %v344_v24, %v342_v23 }
  0xf2   : > { %v356_v62 = vmul.f32 %v351_v45, %v347_v53  ;;  %v357_v63 = vmul.f32 %v355_v49, %v346_v52 }
  0xf4   : > { %v369_v31 = vpop.permute.xlu1 %368  ;;  %v1198_v46 = vpop.permute.xlu0 %426  ;;  %v362_v12 = vmul.f32 %v1168_v13, %v356_v62  ;;  %v363_v17 = vmul.f32 %v1168_v13, %v357_v63  ;;  %v402_v13 = vmul.f32 %v400_v8, %v1153_v3 }
  0xf5   : > { %v371_v60 = vsel %vm370_vm3, %v367_v30, %v369_v31  ;;  %v372_v61 = vsel %vm370_vm3, %v369_v31, %v367_v30  ;;  %v467_v30 = vsub.s32 7, %v1176_v25 }
  0xf6   : > { %v381_v6 = vmul.f32 %v376_v56, %v372_v61  ;;  %v382_v7 = vmul.f32 %v380_v57, %v371_v60  ;;  %v364_v31 = vadd.f32 %v362_v12, %v339_v18  ;;  %v365_v32 = vadd.f32 %v363_v17, %v340_v19  ;;  %v680_v57 = vld [vmem:[#allocation5 + $0x10] ss:$0 sm:$0xff] }
  0xf7   : > { %v468_v44 = vrot.slane %v1184_v34, %v467_v30  ;;  %v472_v45 = vrot.slane %v1186_v35, %v467_v30  ;;  %v404_v47 = vcombine.high %v402_v13, %v402_v13  ;;  %v681_v35 = vld [vmem:[#allocation5 + $0x18] ss:$0 sm:$0xff] }
  0xf8   : > { %v1191_v39 = vpop.permute.xlu1 %451  ;;  %v411_v4 = vpop.permute.xlu0 %410  ;;  %v387_v15 = vmul.f32 %v1174_v21, %v381_v6  ;;  %v388_v23 = vmul.f32 %v1174_v21, %v382_v7 }
  0xfa   : > { %v389_v40 = vadd.f32 %v387_v15, %v364_v31  ;;  %v390_v41 = vadd.f32 %v388_v23, %v365_v32 }
  0xfc   : > { %v409_v54 = vpop.permute.xlu1 %408  ;;  %v434_v26 = vpop.permute.xlu0 %433  ;;  %v406_v50 = vadd.f32 %v402_v13, %v389_v40  ;;  %v407_v51 = vadd.f32 %v404_v47, %v390_v41 }
  0xfd   : > { %v413_v14 = vsel %vm412_vm4, %v409_v54, %v411_v4  ;;  %v414_v24 = vsel %vm412_vm4, %v411_v4, %v409_v54 }
  0xfe   : > { %v423_v21 = vmul.f32 %v418_v16, %v413_v14  ;;  %v424_v37 = vmul.f32 %v422_v20, %v414_v24 }
 0x100   : > { %v477_v5 = vpop.permute.xlu1 %476  ;;  %v502_v42 = vpop.permute.xlu0 %501  ;;  %v429_v25 = vmul.f32 %v1198_v46, %v423_v21  ;;  %v430_v48 = vmul.f32 %v1198_v46, %v424_v37 }
 0x102   : > { %v431_v58 = vadd.f32 %v429_v25, %v406_v50  ;;  %v432_v59 = vadd.f32 %v430_v48, %v407_v51 }
 0x104   : > { %v436_v22 = vpop.permute.xlu1 %435  ;;  %v484_v60 = vpop.permute.xlu0 %483 }
 0x105   : > { %v438_v33 = vsel %vm437_vm5, %v434_v26, %v436_v22  ;;  %v439_v36 = vsel %vm437_vm5, %v436_v22, %v434_v26 }
 0x106   : > { %v448_v3 = vmul.f32 %v443_v27, %v438_v33  ;;  %v449_v43 = vmul.f32 %v447_v29, %v439_v36 }
 0x108   : > { %v459_v38 = vpop.permute.xlu1 %458  ;;  %v454_v54 = vmul.f32 %v1191_v39, %v448_v3  ;;  %v455_v55 = vmul.f32 %v1191_v39, %v449_v43  ;;  %v512_v10 = vpop.permute.xlu0 %511 }
 0x10a   : > { %v456_v2 = vadd.f32 %v454_v54, %v431_v58  ;;  %v457_v4 = vadd.f32 %v455_v55, %v432_v59 }
 0x10c   : > { %v461_v49 = vpop.permute.xlu1 %460 }
 0x10d   : > { %v463_v52 = vsel %vm462_vm6, %v459_v38, %v461_v49  ;;  %v464_v53 = vsel %vm462_vm6, %v461_v49, %v459_v38 }
 0x10e   : > { %v473_v56 = vmul.f32 %v468_v44, %v463_v52  ;;  %v474_v34 = vmul.f32 %v472_v45, %v464_v53 }
 0x110   : > { %v479_v61 = vmul.f32 %v477_v5, %v473_v56  ;;  %v480_v46 = vmul.f32 %v477_v5, %v474_v34  ;;  %v486_v62 = vpop.permute.xlu1 %485 }
 0x111   : > { %v488_v63 = vsel %vm487_vm7, %v484_v60, %v486_v62  ;;  %v489_v0 = vsel %vm487_vm7, %v486_v62, %v484_v60 }
 0x112   : > { %v498_v1 = vmul.f32 %v680_v57, %v488_v63  ;;  %v499_v39 = vmul.f32 %v681_v35, %v489_v0  ;;  %v481_v6 = vadd.f32 %v479_v61, %v456_v2  ;;  %v482_v7 = vadd.f32 %v480_v46, %v457_v4 }
 0x114   : > { %v504_v8 = vmul.f32 %v502_v42, %v498_v1  ;;  %v505_v9 = vmul.f32 %v502_v42, %v499_v39 }
 0x116   : > { %v506_v5 = vadd.f32 %v504_v8, %v481_v6  ;;  %v507_v11 = vadd.f32 %v505_v9, %v482_v7 }
 0x118   : > { %v514_v12 = vadd.f32 %v512_v10, %v506_v5  ;;  %v515_v17 = vadd.f32 %v512_v10, %v507_v11 }
 0x11a   : > { %v516_v16 = vmul.f32 0.01, %v514_v12  ;;  %v517_v28 = vmul.f32 0.01, %v515_v17 }
 0x11c   : > { %v518_v18 = vmax.f32 %v514_v12, %v516_v16  ;;  %v519_v19 = vmax.f32 %v515_v17, %v517_v28 }
 0x11e   : > { %v522_v20 = vcombine.low %v518_v18, %v519_v19 }
 0x120   : > { %524 = vst [vmem:[%s272_s7] sm:$0xff] %v522_v20 }
 0x121   : > { %864 = shalt.err (!%p861_p5)
}
 0x122   : > { %s865_s6 = scalar_lea.hbm %s1244_s25, 128  ;;  %s869_s13 = scalar_lea.hbm %s1297_s4, 256 }
 0x123   : > { %p866_p9 = scmp.ne.s32.totalorder %s1244_s25, %s865_s6  ;;  %p870_p7 = scmp.lt.u32.totalorder %s1244_s25, %s1297_s4 }
 0x124   : > { %p871_p3 = scmp.lt.u32.totalorder %s869_s13, %s865_s6  ;;  %p873_p4 = scmp.lt.u32.totalorder %s865_s6, %s1244_s25 }
 0x125   : > { %p867_p1 = pnand %p866_p9, %p1083_p10 }
 0x126   : > { %p872_p13 = por %p871_p3, %p870_p7 }
 0x127   : > { %p868_p2 = pneg %p867_p1 }
 0x128   : > { %p874_p6 = por %p873_p4, %p872_p13 }
 0x12a   : > { %p875_p8 = pnand %p874_p6, %p868_p2 }
 0x12c   : > { %878 = shalt.err (!%p875_p8)
}
 0x12d   : > { %695 = dma.vmem_to_hbm [thread:$0]  (%p1083_p10), %s1246_s27, 128, %s1244_s25, %s526_s21  }
 0x12e PF: > { %s554_s11 = sand.u32 1, %s917_s15   ;;  %p1315_p12 = scmp.ne.s32.totalorder %s1305_s26, 0 }
 0x12f   : > { %p1316_p11 = scmp.ge.s32.totalorder %s937_s20, 2  ;;  %s555_s7 = scalar_lea.sflag [#allocation4], %s554_s11 }
 0x131   : > { %p706_p0 = pnand %p1316_p11, %p1315_p12 }
 0x133   : > { %912 = dma.done.wait (!%p706_p0), %s555_s7, 128  }
 0x134   : > { %914 = vsyncadd (!%p706_p0), %s555_s7, 4294967168  ;;  %s21_s20 = sadd.s32 1, %s937_s20   ;;  %s1317_s15 = smov %s921_s16 }
 0x135   : > { %p18_p5 = scmp.ge.s32.totalorder %s21_s20, 4   ;;  %s1318_s16 = smov %s925_s17 }
 0x136   : > { %s1319_s17 = smov %s1092_s10  ;;  %s1320_s18 = smov %s933_s19 }
 0x137   : > { %s1321_s19 = smov %s1323_s5  ;;  %20 = sbr.rel (!%p18_p5) target bundleno = 7 (0x7), region = 91 }
 0x13e   :  { %560 = vsyncpa [#allocation3], 1 }
 0x13f   :  { %562 = vsyncpa [#allocation3 + $0x1], 1 }
 0x140   :  { %563 = vsyncpa [#allocation6], 1 }
 0x141   :  { %564 = vsyncpa [#allocation4], 1 }
 0x142   :  { %566 = vsyncpa [#allocation4 + $0x1], 1 }

</bundles_post_ra>
